<compile_context>
chip_gen: v7x
topology: tpu7x:2x2x1
jax: 0.10.0
libtpu: 0.0.40
codegen_flags: <defaults>
</compile_context>

<pallas_src>
import jax
import jax.numpy as jnp
from jax.experimental import pallas as pl
from jax.experimental.pallas import tpu as pltpu


# --------------------------------------------------------------------------
# Kernel body
# --------------------------------------------------------------------------
def _bin_shuffle_kernel(x_ref, w1_ref, b1_ref, w2_ref, b2_ref, o_ref):
    # In-kernel cast of the f32 input rows to the bf16 MXU operand dtype:
    # pure VPU work hidden under the DMA bound; removes the wrapper-side cast
    # pass over x (~2x less input-side HBM traffic).
    x = x_ref[...].astype(w1_ref.dtype)
    # Linear1 (BN1 scale pre-folded into the block-diagonal weight), f32 acc.
    h = jnp.dot(x, w1_ref[...], preferred_element_type=jnp.float32)
    # BN1 shift + ReLU in f32 (v5e VPU has no bf16).
    h = jnp.maximum(h + b1_ref[...], 0.0)
    # Linear2 (BN2 scale pre-folded); activations back to bf16 for the MXU.
    y = jnp.dot(h.astype(w2_ref.dtype), w2_ref[...],
                preferred_element_type=jnp.float32)
    # BN2 shift + ReLU; packed layout -> full 128-lane unmasked stores, and
    # the bf16 output dtype halves store-side HBM traffic vs f32.
    o_ref[...] = jnp.maximum(y + b2_ref[...], 0.0).astype(o_ref.dtype)


# --------------------------------------------------------------------------
# One-time parameter preparation (hoisted out of the per-call path)
# --------------------------------------------------------------------------
def prepare_bin_shuffle_params(w1, bn1, w2, bn2, *, weight_dtype=jnp.bfloat16):
    """Fold eval-mode BatchNorm into the Linear weights and build the
    lane-dense block-diagonal operands.  Weights / running stats are static in
    eval mode, so call this ONCE per checkpoint and reuse the result."""
    hdim, c_in = w1.shape
    c_out = w2.shape[0]

    def fold(bn):
        inv = (bn["gamma"] / jnp.sqrt(bn["var"] + bn["eps"])).astype(jnp.float32)
        shift = (bn["beta"] - bn["mean"] * inv).astype(jnp.float32)
        return inv, shift

    s1, b1 = fold(bn1)
    s2, b2 = fold(bn2)
    w1_eff = jnp.asarray(w1, jnp.float32).T * s1[None, :]        # (C_in, H)
    w2_eff = jnp.asarray(w2, jnp.float32).T * s2[None, :]        # (H, C_out)

    # Lane packing: view `pack` consecutive batch rows as one 128-lane row and
    # make the weights block-diagonal.  Fully lane-dense when 128 % C_in == 0
    # and 128 % C_out == 0 (true for 32/16/32); other channel counts still run
    # correctly, just with partially masked lanes.
    pack = max(1, 128 // max(c_in, c_out))
    eye = jnp.eye(pack, dtype=jnp.float32)
    w1_blk = jnp.kron(eye, w1_eff).astype(weight_dtype)          # (p*C_in, p*H)
    w2_blk = jnp.kron(eye, w2_eff).astype(weight_dtype)          # (p*H, p*C_out)
    b1_blk = jnp.tile(b1, pack).reshape(1, pack * hdim)          # f32 shift
    b2_blk = jnp.tile(b2, pack).reshape(1, pack * c_out)         # f32 shift

    return dict(pack=pack, c_in=c_in, hdim=hdim, c_out=c_out,
                w1_blk=w1_blk, b1_blk=b1_blk, w2_blk=w2_blk, b2_blk=b2_blk,
                w1_eff=w1_eff, b1=b1, w2_eff=w2_eff, b2=b2)


# --------------------------------------------------------------------------
# Tiling helpers
# --------------------------------------------------------------------------
def _default_tile_rows():
    # Target several MiB of HBM traffic per grid step so the ~0.35 us fixed
    # per-step overhead is <10% of step time; bigger on faster-HBM chips.
    try:
        kind = jax.devices()[0].device_kind.lower()
    except Exception:
        return 32768
    if "v5 lite" in kind or "v5e" in kind:
        return 16384            # ~820 GB/s HBM
    if "v6" in kind:
        return 32768            # ~1.4 TB/s HBM
    return 49152                # v7x & newer, ~3.2 TB/s per TC


def _physical_vmem_bytes():
    try:
        return int(pltpu.get_tpu_info().vmem_capacity_bytes)
    except Exception:
        return 64 * 2**20       # v7x per-core size = safe lower bound


def _vmem_footprint(tile_p, pack, c_in, hdim, c_out,
                    x_itemsize, w_itemsize, out_itemsize):
    # Everything resident in VMEM at once: double-buffered x / y tiles, the
    # (also double-buffered) weights & shifts, plus the in-kernel
    # intermediates (bf16 copy of x, f32 h and its bf16 copy).
    per_row = (2 * pack * c_in * x_itemsize
               + 2 * pack * c_out * out_itemsize
               + pack * c_in * w_itemsize
               + pack * hdim * (4 + w_itemsize))
    weights = (2 * (pack * c_in * pack * hdim
                    + pack * hdim * pack * c_out) * w_itemsize
               + 2 * (pack * hdim + pack * c_out) * 4)
    return tile_p * per_row + weights


# --------------------------------------------------------------------------
# Forward
# --------------------------------------------------------------------------
def _packed_forward(x_main, params, tile_rows, out_dtype):
    pack, c_in = params["pack"], params["c_in"]
    hdim, c_out = params["hdim"], params["c_out"]
    w1_blk, b1_blk = params["w1_blk"], params["b1_blk"]
    w2_blk, b2_blk = params["w2_blk"], params["b2_blk"]

    n_main = x_main.shape[0]
    n_p = n_main // pack
    # Pure row-major reshape = free view in HBM (no cast, no copy).
    x_p = x_main.reshape(n_p, pack * c_in)

    x_itemsize = jnp.dtype(x_p.dtype).itemsize
    w_itemsize = jnp.dtype(w1_blk.dtype).itemsize
    out_itemsize = jnp.dtype(out_dtype).itemsize

    # Sublane granularity of a non-full-extent block: 8 rows for f32,
    # 16 for bf16 -> take the strictest of the HBM-visible operands.
    row_mult = max(8 * (4 // x_itemsize), 8 * (4 // out_itemsize))

    tile_p = max(row_mult, (tile_rows // pack) // row_mult * row_mult)
    # Keep >= 2 grid steps so v7x's two TensorCores both get work
    # (dimension_semantics=("parallel",) shards the row grid across them).
    if n_p >= 2 * row_mult:
        tile_p = min(tile_p, max(row_mult, (n_p // 2) // row_mult * row_mult))
    if tile_p >= n_p:
        tile_p = n_p                         # single full-extent block

    # Shrink the tile until the real footprint (incl. intermediates) fits
    # comfortably under the chip's physical VMEM; leave headroom for the
    # compiler's internal scratch (esp. v7x's 64 MiB).
    cap = _physical_vmem_bytes() * 3 // 4

    def fp(tp):
        return _vmem_footprint(tp, pack, c_in, hdim, c_out,
                               x_itemsize, w_itemsize, out_itemsize)

    while tile_p > row_mult and fp(tile_p) > cap * 3 // 5:
        tile_p = max(row_mult, (tile_p // 2) // row_mult * row_mult)
    vmem_limit = int(min(cap, max(16 * 2**20, 2 * fp(tile_p))))

    num_tiles = pl.cdiv(n_p, tile_p)

    cost = pl.CostEstimate(
        flops=int(2 * n_main * hdim * (c_in + c_out)),
        transcendentals=0,
        bytes_accessed=int(n_main * c_in * x_itemsize
                           + n_main * c_out * out_itemsize
                           + (w1_blk.size + w2_blk.size) * w_itemsize
                           + (b1_blk.size + b2_blk.size) * 4),
    )

    out_p = pl.pallas_call(
        _bin_shuffle_kernel,
        out_shape=jax.ShapeDtypeStruct((n_p, pack * c_out), out_dtype),
        grid=(num_tiles,),
        in_specs=[
            pl.BlockSpec((tile_p, pack * c_in), lambda i: (i, 0)),        # x tile
            pl.BlockSpec((pack * c_in, pack * hdim), lambda i: (0, 0)),   # W1 (resident)
            pl.BlockSpec((1, pack * hdim), lambda i: (0, 0)),             # shift1
            pl.BlockSpec((pack * hdim, pack * c_out), lambda i: (0, 0)),  # W2 (resident)
            pl.BlockSpec((1, pack * c_out), lambda i: (0, 0)),            # shift2
        ],
        out_specs=pl.BlockSpec((tile_p, pack * c_out), lambda i: (i, 0)),
        compiler_params=pltpu.CompilerParams(
            dimension_semantics=("parallel",),
            vmem_limit_bytes=vmem_limit,
        ),
        cost_estimate=cost,
    )(x_p, w1_blk, b1_blk, w2_blk, b2_blk)

    # Free row-major reshape back to (rows, C_out).
    return out_p.reshape(n_main, c_out)


def bin_shuffle_forward(x, params, *, tile_rows=None, out_dtype=jnp.bfloat16):
    """x: (N, C_in) float rows.  `params` from prepare_bin_shuffle_params."""
    n = x.shape[0]
    pack = params["pack"]
    if tile_rows is None:
        tile_rows = _default_tile_rows()

    n_main = (n // pack) * pack
    pieces = []
    if n_main:
        x_main = x if n_main == n else x[:n_main]
        pieces.append(_packed_forward(x_main, params, tile_rows, out_dtype))
    if n_main != n:
        # <= pack-1 leftover rows: tiny plain-JAX epilogue instead of padding
        # the whole input and re-slicing the whole output (both would be full
        # extra HBM passes for a memory-bound op).
        xr = x[n_main:].astype(jnp.float32)
        h = jnp.maximum(xr @ params["w1_eff"] + params["b1"], 0.0)
        yr = jnp.maximum(h @ params["w2_eff"] + params["b2"], 0.0)
        pieces.append(yr.astype(out_dtype))
    return pieces[0] if len(pieces) == 1 else jnp.concatenate(pieces, axis=0)


# --------------------------------------------------------------------------
# Pure-JAX reference (eval-mode BatchNorm)
# --------------------------------------------------------------------------
def _reference(x, w1, bn1, w2, bn2):
    def bn(z, p):
        return (z - p["mean"]) / jnp.sqrt(p["var"] + p["eps"]) * p["gamma"] + p["beta"]

    h = jnp.maximum(bn(x @ w1.T, bn1), 0.0)
    y = jnp.maximum(bn(h @ w2.T, bn2), 0.0)
    return y


if __name__ == "__main__":
    key = jax.random.PRNGKey(0)
    n, in_channels, out_channels = 128, 32, 32
    hidden = in_channels // 2

    k = jax.random.split(key, 8)
    x = jax.random.normal(k[0], (n, in_channels), jnp.float32)

    # Deterministic synthetic parameters (shapes from the module __init__).
    w1 = jax.random.normal(k[1], (hidden, in_channels), jnp.float32) * 0.1
    w2 = jax.random.normal(k[2], (out_channels, hidden), jnp.float32) * 0.1
    bn1 = dict(
        gamma=1.0 + 0.1 * jax.random.normal(k[3], (hidden,), jnp.float32),
        beta=0.1 * jax.random.normal(k[4], (hidden,), jnp.float32),
        mean=0.05 * jax.random.normal(k[5], (hidden,), jnp.float32),
        var=jnp.abs(1.0 + 0.1 * jax.random.normal(k[6], (hidden,), jnp.float32)),
        eps=1e-3,
    )
    bn2 = dict(
        gamma=1.0 + 0.1 * jax.random.normal(k[7], (out_channels,), jnp.float32),
        beta=jnp.linspace(-0.1, 0.1, out_channels, dtype=jnp.float32),
        mean=jnp.linspace(-0.05, 0.05, out_channels, dtype=jnp.float32),
        var=jnp.linspace(0.9, 1.1, out_channels, dtype=jnp.float32),
        eps=1e-3,
    )

    # Weight prep happens ONCE (eval-mode weights / running stats are static).
    params = prepare_bin_shuffle_params(w1, bn1, w2, bn2)

    # Default (generation-aware) tiling; the >=2-grid-step clamp still gives a
    # multi-step pipelined grid at this tiny size (pack=4 -> 32 packed rows,
    # 16-row tiles -> 2 grid steps).
    out = bin_shuffle_forward(x, params)
    out = jax.block_until_ready(out)

    ref = _reference(x, w1, bn1, w2, bn2)
    assert out.shape == (n, out_channels)
    assert out.dtype == jnp.bfloat16
    # bf16 MXU operands + bf16 output -> relaxed tolerance vs pure-f32 ref.
    assert jnp.allclose(out.astype(jnp.float32), ref, atol=4e-2, rtol=4e-2), \
        "mismatch vs reference"
    print("KERNEL_OK")
</pallas_src>

<mosaic_0001>
module attributes {stable_mosaic.version = 11 : i64} {
  func.func @_bin_shuffle_kernel(%arg0: i32, %arg1: memref<16x128xf32, #tpu.memory_space<vmem>>, %arg2: memref<128x64xbf16, #tpu.memory_space<vmem>>, %arg3: memref<1x64xf32, #tpu.memory_space<vmem>>, %arg4: memref<64x128xbf16, #tpu.memory_space<vmem>>, %arg5: memref<1x128xf32, #tpu.memory_space<vmem>>, %arg6: memref<16x128xbf16, #tpu.memory_space<vmem>>) attributes {dimension_semantics = [#tpu.dimension_semantics<parallel>], iteration_bounds = array<i64: 2>, scalar_prefetch = 0 : i64, scratch_operands = 0 : i64, tpu.core_type = #tpu.core_type<tc>, window_params = [{transform_indices = @transform_0, window_bounds = array<i64: 16, 128>}, {pipeline_mode = #tpu.pipeline_mode<synchronous>, transform_indices = @transform_1, window_bounds = array<i64: 128, 64>}, {pipeline_mode = #tpu.pipeline_mode<synchronous>, transform_indices = @transform_2, window_bounds = array<i64: 1, 64>}, {pipeline_mode = #tpu.pipeline_mode<synchronous>, transform_indices = @transform_3, window_bounds = array<i64: 64, 128>}, {pipeline_mode = #tpu.pipeline_mode<synchronous>, transform_indices = @transform_4, window_bounds = array<i64: 1, 128>}, {transform_indices = @transform_5, window_bounds = array<i64: 16, 128>}]} {
    %c0 = arith.constant 0 : index
    %c0_0 = arith.constant 0 : index
    %0 = vector.load %arg1[%c0, %c0_0] : memref<16x128xf32, #tpu.memory_space<vmem>>, vector<16x128xf32>
    %1 = arith.truncf %0 : vector<16x128xf32> to vector<16x128xbf16>
    %c0_1 = arith.constant 0 : index
    %c0_2 = arith.constant 0 : index
    %2 = vector.load %arg2[%c0_1, %c0_2] : memref<128x64xbf16, #tpu.memory_space<vmem>>, vector<128x64xbf16>
    %cst = arith.constant dense<0.000000e+00> : vector<16x64xf32>
    %3 = tpu.matmul %1, %2, %cst {dimension_numbers = #tpu.dot_dimension_numbers<[1], [0], [0], [1], [0, 0, 1, 1], [], []>} : vector<16x128xbf16>, vector<128x64xbf16>, vector<16x64xf32> -> vector<16x64xf32>
    %c0_3 = arith.constant 0 : index
    %c0_4 = arith.constant 0 : index
    %4 = vector.load %arg3[%c0_3, %c0_4] : memref<1x64xf32, #tpu.memory_space<vmem>>, vector<1x64xf32>
    %5 = vector.broadcast %4 : vector<1x64xf32> to vector<16x64xf32>
    %6 = arith.addf %3, %5 : vector<16x64xf32>
    %cst_5 = arith.constant 0.000000e+00 : f32
    %7 = vector.broadcast %cst_5 : f32 to vector<16x64xf32>
    %8 = arith.maximumf %6, %7 : vector<16x64xf32>
    %9 = arith.truncf %8 : vector<16x64xf32> to vector<16x64xbf16>
    %c0_6 = arith.constant 0 : index
    %c0_7 = arith.constant 0 : index
    %10 = vector.load %arg4[%c0_6, %c0_7] : memref<64x128xbf16, #tpu.memory_space<vmem>>, vector<64x128xbf16>
    %cst_8 = arith.constant dense<0.000000e+00> : vector<16x128xf32>
    %11 = tpu.matmul %9, %10, %cst_8 {dimension_numbers = #tpu.dot_dimension_numbers<[1], [0], [0], [1], [0, 0, 1, 1], [], []>} : vector<16x64xbf16>, vector<64x128xbf16>, vector<16x128xf32> -> vector<16x128xf32>
    %c0_9 = arith.constant 0 : index
    %c0_10 = arith.constant 0 : index
    %12 = vector.load %arg5[%c0_9, %c0_10] : memref<1x128xf32, #tpu.memory_space<vmem>>, vector<1x128xf32>
    %13 = vector.broadcast %12 : vector<1x128xf32> to vector<16x128xf32>
    %14 = arith.addf %11, %13 : vector<16x128xf32>
    %cst_11 = arith.constant 0.000000e+00 : f32
    %15 = vector.broadcast %cst_11 : f32 to vector<16x128xf32>
    %16 = arith.maximumf %14, %15 : vector<16x128xf32>
    %17 = arith.truncf %16 : vector<16x128xf32> to vector<16x128xbf16>
    %c0_12 = arith.constant 0 : index
    %c0_13 = arith.constant 0 : index
    %18 = vector.load %arg6[%c0_12, %c0_13] : memref<16x128xbf16, #tpu.memory_space<vmem>>, vector<16x128xbf16>
    tpu.vector_store %arg6[%c0_12, %c0_13], %17 {strides = array<i32>} : memref<16x128xbf16, #tpu.memory_space<vmem>>, vector<16x128xbf16>,
    return
  }
  func.func @transform_0(%arg0: i32) -> (i32, i32) {
    %c0_i32 = arith.constant 0 : i32
    %c0_i32_0 = arith.constant 0 : i32
    return %arg0, %c0_i32 : i32, i32
  }
  func.func @transform_1(%arg0: i32) -> (i32, i32) {
    %c0_i32 = arith.constant 0 : i32
    %c0_i32_0 = arith.constant 0 : i32
    %c0_i32_1 = arith.constant 0 : i32
    return %c0_i32, %c0_i32_0 : i32, i32
  }
  func.func @transform_2(%arg0: i32) -> (i32, i32) {
    %c0_i32 = arith.constant 0 : i32
    %c0_i32_0 = arith.constant 0 : i32
    %c0_i32_1 = arith.constant 0 : i32
    return %c0_i32, %c0_i32_0 : i32, i32
  }
  func.func @transform_3(%arg0: i32) -> (i32, i32) {
    %c0_i32 = arith.constant 0 : i32
    %c0_i32_0 = arith.constant 0 : i32
    %c0_i32_1 = arith.constant 0 : i32
    return %c0_i32, %c0_i32_0 : i32, i32
  }
  func.func @transform_4(%arg0: i32) -> (i32, i32) {
    %c0_i32 = arith.constant 0 : i32
    %c0_i32_0 = arith.constant 0 : i32
    %c0_i32_1 = arith.constant 0 : i32
    return %c0_i32, %c0_i32_0 : i32, i32
  }
  func.func @transform_5(%arg0: i32) -> (i32, i32) {
    %c0_i32 = arith.constant 0 : i32
    %c0_i32_0 = arith.constant 0 : i32
    return %arg0, %c0_i32 : i32, i32
  }
}

</mosaic_0001>

<bundles_post_ra>
// kernel: tpu_custom_call.1
= control target key start
LH: loop header
LB: loop body
LE: loop exit
PB: predicated region body
PF: predicated region fallthrough
CT: control target
= control target key end

     0   :  { %10 = vsyncpa [#allocation3], 0  ;;  %s898_s0 = inlined_call_operand.vmem [shape: f32[32,128], index: 0, kind: input, shape index: {}]   ;;  %s899_s1 = inlined_call_operand.vmem [shape: bf16[128,64], index: 1, kind: input, shape index: {}]   ;;  %s900_s2 = inlined_call_operand.vmem [shape: f32[1,64], index: 2, kind: input, shape index: {}]   ;;  %s901_s3 = inlined_call_operand.vmem [shape: bf16[64,128], index: 3, kind: input, shape index: {}]   ;;  %s902_s4 = inlined_call_operand.vmem [shape: f32[1,128], index: 4, kind: input, shape index: {}]   ;;  %s903_s5 = inlined_call_operand.hbm [shape: bf16[32,128], index: 5, kind: output, shape index: {}]  }
   0x1   :  { %12 = vsyncpa [#allocation3 + $0x1], 0  ;;  %s754_s18 = smov 0   ;;  %s756_s19 = smov 0  }
   0x2   :  { %s758_s20 = smov 0   ;;  %s760_s21 = smov 0  }
   0x3 LB: > { %s775_s22 = sadd.s32 4294967295, %s717_s21   ;;  %s517_s23 = sadd.s32 4294967294, %s717_s21   ;;  %s717_s21 = sphi %s760_s21, %s909_s21   ;;  %s713_s20 = sphi %s758_s20, %s908_s20   ;;  %s709_s19 = sphi %s756_s19, %s907_s19   ;;  %s705_s18 = sphi %s754_s18, %s906_s18  }
   0x4   : > { %s779_s24 = sadd.s32 1, %s717_s21   ;;  %s135_s25 = sadd.s32 1, %s713_s20 }
   0x5   : > { %s132_s26 = ssub.s32 %s717_s21, %s779_s24  ;;  %p145_p0 = scmp.ne.s32.totalorder %s713_s20, %s709_s19 }
   0x6   : > { %p133_p1 = scmp.eq.s32.totalorder %s132_s26, 0  ;;  %p146_p2 = scmp.eq.s32.totalorder %s775_s22, 1 }
   0x7   : > { %p151_p3 = scmp.ne.s32.totalorder %s709_s19, %s705_s18  ;;  %p152_p4 = scmp.eq.s32.totalorder %s517_s23, 1 }
   0x8   : > { %s790_s27 = scalar_select %p133_p1, %s713_s20, %s135_s25  }
   0x9   : > { %p792_p5 = por %p146_p2, %p145_p0  ;;  %p796_p6 = por %p152_p4, %p151_p3 }
   0xa   : > { %p520_p7 = scmp.ge.s32.totalorder %s717_s21, 1  ;;  %p191_p8 = scmp.lt.s32.totalorder %s717_s21, 3 }
   0xc   : > { %p192_p9 = pnand %p520_p7, %p191_p8 }
   0xd   : > { %v643_v0 = vld [vmem:[%s899_s1] sm:$0xff] (!%p192_p9)   ;;  %v719_v1 = vmov (!%p192_p9), 0.0   ;;  %v644_v2 = vld [vmem:[%s899_s1 + $0x8] sm:$0xff] (!%p192_p9)   ;;  %vm720_vm0 = vmmov (!%p192_p9), 0   ;;  %v645_v3 = vld [vmem:[%s899_s1 + $0x10] sm:$0xff] (!%p192_p9)   ;;  %s522_s13 = sshll.u32 (!%p192_p9), %s775_s22, 1 }
   0xe   : > { %195 = sbr.rel (%p192_p9) target bundleno = 501 (0x1f5), region = 40  ;;  %568 = vmatprep.subr.bf16.mxu0 (!%p192_p9), %v719_v1  ;;  %588 = vmatprep.subr.bf16.mxu1 (!%p192_p9), %v719_v1  ;;  %v651_v4 = vld [vmem:[%s901_s3] sm:$0xff] (!%p192_p9)   ;;  %v646_v5 = vld [vmem:[%s899_s1 + $0x18] sm:$0xff] (!%p192_p9)   ;;  %v652_v6 = vld [vmem:[%s901_s3 + $0x8] sm:$0xff] (!%p192_p9)   ;;  %p220_p10 = scmp.lt.s32.totalorder (!%p192_p9), %s522_s13, 3  ;;  %vm384_vm1 = vcmask (!%p192_p9), 523264  }
   0xf   : > { %569 = vmatpush3.bf16.msra.mxu0 (!%p192_p9), %v643_v0  ;;  %584 = vmatprep.mubr.msk.bf16.mxu0 (!%p192_p9), %vm720_vm0, %v719_v1  ;;  %v647_v7 = vld [vmem:[%s899_s1 + $0x20] sm:$0xff] (!%p192_p9)   ;;  %v648_v8 = vld [vmem:[%s899_s1 + $0x28] sm:$0xff] (!%p192_p9)   ;;  %v649_v9 = vld [vmem:[%s899_s1 + $0x30] sm:$0xff] (!%p192_p9)   ;;  %s216_s26 = sand.u32 (!%p192_p9), 1, %s709_s19   ;;  %s548_s10 = sshll.u32 (!%p192_p9), %s775_s22, 7 }
  0x10   : > { %570 = vmatprep.subr.bf16.mxu0 (!%p192_p9), %v719_v1  ;;  %596 = vmatprep.mubr.msk.bf16.mxu1 (!%p192_p9), %vm720_vm0, %v719_v1  ;;  %v650_v10 = vld [vmem:[%s899_s1 + $0x38] sm:$0xff] (!%p192_p9)   ;;  %v653_v14 = vld [vmem:[%s901_s3 + $0x10] sm:$0xff] (!%p192_p9)   ;;  %v524_v16 = vld [vmem:[%s900_s2] ss:$0 sm:$0xff] (!%p192_p9)  ;;  %s521_s30 = sshll.u32 (!%p192_p9), %s216_s26, 3  ;;  %s855_s14 = scalar_lea.hbm (!%p192_p9), %s903_s5, %s548_s10 }
  0x11   : > { %589 = vmatpush3.bf16.msra.mxu1 (!%p192_p9), %v651_v4  ;;  %v654_v15 = vld [vmem:[%s901_s3 + $0x18] sm:$0xff] (!%p192_p9)   ;;  %v533_v26 = vld [vmem:[%s902_s4] ss:$0 sm:$0xff] (!%p192_p9)  ;;  %s218_s8 = scalar_lea.vmem (!%p192_p9), [#allocation2], %s521_s30  ;;  %s721_s22 = smov (!%p192_p9), [#allocation2]  }
  0x12   : > { %590 = vmatprep.subr.bf16.mxu1 (!%p192_p9), %v719_v1  ;;  %s455_s9 = sshll.u32 (!%p192_p9), %s218_s8, 4  ;;  %s659_s16 = sshll.u32 (!%p192_p9), %s721_s22, 4  ;;  %s850_s9 = int_to_ptr.vmem [resolvable:$true] %s455_s9  ;;  %s660_s16 = int_to_ptr.vmem [resolvable:$false] %s659_s16 }
  0x13   : > { %571 = vmatpush3.bf16.msra.mxu0 (!%p192_p9), %v644_v2  ;;  %s655_s15 = scalar_lea.vmem (!%p192_p9), %s850_s9, 128  ;;  %s661_s17 = scalar_lea.vmem (!%p192_p9), %s660_s16, 256 }
  0x14   : > { %572 = vmatprep.subr.bf16.mxu0 (!%p192_p9), %v719_v1  ;;  %p656_p11 = scmp.ne.s32.totalorder (!%p192_p9), %s850_s9, %s655_s15  ;;  %p662_p0 = scmp.lt.s32.totalorder (!%p192_p9), %s850_s9, %s660_s16 }
  0x15   : > { %591 = vmatpush3.bf16.msra.mxu1 %v652_v6  ;;  %s911_s13 = smov (!%p220_p10, %s522_s13), 3  ;;  %p663_p1 = scmp.lt.s32.totalorder %s661_s17, %s655_s15 }
  0x16   : > { %592 = vmatprep.subr.bf16.mxu1 %v719_v1  ;;  %s523_s6 = sshll.u32 %s911_s13, 3  ;;  %s857_s13 = scalar_lea.sflag [#allocation3], %s216_s26 }
  0x17   : > { %573 = vmatpush3.bf16.msra.mxu0 %v645_v3  ;;  %s223_s11 = scalar_lea.vmem %s898_s0, %s523_s6  ;;  %p657_p12 = pnand %p656_p11, %p792_p5 }
  0x18   : > { %574 = vmatprep.subr.bf16.mxu0 %v719_v1  ;;  %v227_v11 = vld [vmem:[%s223_s11] sm:$0xff]  ;;  %v228_v12 = vld [vmem:[%s223_s11 + $0x8] sm:$0xff]  ;;  %p664_p2 = por %p663_p1, %p662_p0 }
  0x19   : > { %v229_v13 = vpack.c.bf16 %v228_v12, %v227_v11  ;;  %593 = vmatpush3.bf16.msra.mxu1 %v653_v14  ;;  %p658_p13 = pneg %p657_p12 }
  0x1a   : > { %594 = vmatprep.subr.bf16.mxu1 %v719_v1 }
  0x1b   : > { %575 = vmatpush3.bf16.msra.mxu0 %v646_v5  ;;  %p665_p3 = pnand %p664_p2, %p658_p13 }
  0x1c   : > { %576 = vmatprep.subr.bf16.mxu0 %v719_v1 }
  0x1d   : > { %595 = vmatpush3.bf16.msra.mxu1 %v654_v15 }
  0x1f   : > { %577 = vmatpush3.bf16.msra.mxu0 %v647_v7 }
  0x20   : > { %578 = vmatprep.subr.bf16.mxu0 %v719_v1 }
  0x23   : > { %579 = vmatpush3.bf16.msra.mxu0 %v648_v8 }
  0x24   : > { %580 = vmatprep.subr.bf16.mxu0 %v719_v1 }
  0x27   : > { %581 = vmatpush3.bf16.msra.mxu0 %v649_v9 }
  0x28   : > { %582 = vmatprep.subr.bf16.mxu0 %v719_v1 }
  0x2b   : > { %583 = vmatpush3.bf16.msra.mxu0 %v650_v10 }
  0x2e   : > { %585 = vmatmul.mubr.bf16.vlgmr.msra.gmra.mrb[0].mxu0 %v229_v13 }
 0x101   : > { %v335_v17 = vpop.f32.mrb[0].mxu0 }
 0x102   : > { %v336_v18 = vadd.f32 %v524_v16, %v335_v17  ;;  %v586_v19 = vpop.f32.mrb[1].mxu0 }
 0x103   : > { %v338_v20 = vpop.f32.mrb[2].mxu0 }
 0x104   : > { %v339_v21 = vadd.f32 %v524_v16, %v338_v20  ;;  %v587_v22 = vpop.f32.mrb[3].mxu0  ;;  %v342_v23 = vmax.f32 %v336_v18, 0.0 }
 0x106   : > { %v343_v24 = vmax.f32 %v339_v21, 0.0 }
 0x108   : > { %v344_v25 = vpack.c.bf16 %v343_v24, %v342_v23 }
 0x10a   : > { %597 = vmatmul.mubr.msk.bf16.vlgmr.msra.gmra.mrb[0].mxu1 %vm384_vm1, %v344_v25 }
 0x1dd   : > { %v422_v27 = vpop.f32.mrb[0].mxu1 }
 0x1de   : > { %v423_v28 = vadd.f32 %v533_v26, %v422_v27  ;;  %v598_v29 = vpop.f32.mrb[1].mxu1 }
 0x1df   : > { %v425_v30 = vpop.f32.mrb[2].mxu1 }
 0x1e0   : > { %v426_v31 = vadd.f32 %v533_v26, %v425_v30  ;;  %v599_v32 = vpop.f32.mrb[3].mxu1  ;;  %v429_v33 = vmax.f32 %v423_v28, 0.0 }
 0x1e2   : > { %v430_v34 = vmax.f32 %v426_v31, 0.0 }
 0x1e4   : > { %v552_v35 = vpack.c.bf16 %v430_v34, %v429_v33 }
 0x1e6   : > { %553 = vst [vmem:[%s218_s8] sm:$0xff] %v552_v35  }
 0x1e7   : > { %668 = shalt.err (!%p665_p3)
}
 0x1e8   : > { %s669_s23 = scalar_lea.hbm %s855_s14, 128  ;;  %s673_s30 = scalar_lea.hbm %s903_s5, 256 }
 0x1e9   : > { %p670_p4 = scmp.ne.s32.totalorder %s855_s14, %s669_s23  ;;  %p674_p9 = scmp.lt.u32.totalorder %s855_s14, %s903_s5 }
 0x1ea   : > { %p675_p10 = scmp.lt.u32.totalorder %s673_s30, %s669_s23  ;;  %p677_p12 = scmp.lt.u32.totalorder %s669_s23, %s855_s14 }
 0x1eb   : > { %p671_p7 = pnand %p670_p4, %p792_p5 }
 0x1ec   : > { %p676_p11 = por %p675_p10, %p674_p9 }
 0x1ed   : > { %p672_p8 = pneg %p671_p7 }
 0x1ee   : > { %p678_p13 = por %p677_p12, %p676_p11 }
 0x1f0   : > { %p679_p0 = pnand %p678_p13, %p672_p8 }
 0x1f2   : > { %682 = shalt.err (!%p679_p0)
}
 0x1f3   : > { %s722_s8 = smov 64   ;;  %s723_s10 = smov 4  }
 0x1f4   : > { %600 = dma.vmem_to_hbm [thread:$0]  (%p792_p5), %s850_s9, 128, %s855_s14, %s857_s13, %s722_s8, %s722_s8, %s723_s10  }
 0x1f5 PF: > { %p606_p1 = scmp.ge.s32.totalorder %s717_s21, 2  ;;  %s470_s11 = sand.u32 1, %s705_s18  }
 0x1f6   : > { %s471_s12 = scalar_lea.sflag [#allocation3], %s470_s11 }
 0x1f7   : > { %p603_p2 = pnand %p606_p1, %p796_p6 }
 0x1f9   : > { %700 = dma.done.wait (!%p603_p2), %s471_s12, 128  }
 0x1fa   : > { %702 = vsyncadd (!%p603_p2), %s471_s12, 4294967168  ;;  %p15_p3 = scmp.ge.s32.totalorder %s779_s24, 4   ;;  %s906_s18 = smov %s709_s19 }
 0x1fb   : > { %s907_s19 = smov %s713_s20  ;;  %s908_s20 = smov %s790_s27 }
 0x1fc   : > { %s909_s21 = smov %s779_s24  ;;  %17 = sbr.rel (!%p15_p3) target bundleno = 3 (0x3), region = 75 }
 0x203   :  { %476 = vsyncpa [#allocation3], 1 }
 0x204   :  { %478 = vsyncpa [#allocation3 + $0x1], 1 }

</bundles_post_ra>
